<compile_context>
chip_gen: v5e
topology: v5e:2x2
jax: 0.10.0
libtpu: 0.0.40
codegen_flags: <defaults>
</compile_context>

<pallas_src>
import numpy as np
import jax
import jax.numpy as jnp
from jax.experimental import pallas as pl
from jax.experimental.pallas import tpu as pltpu


def _round_up(x, m):
    return (x + m - 1) // m * m


def _matmul_bn_prelu_kernel(x_ref, w_ref, p_ref, o_ref):
    """One fused matmul tile + BN-shift + PReLU epilogue.

    x_ref: (tm, Kp)   im2col-over-H rows, batch merged into M, zero padded
    w_ref: (Kp, Np)   block-Toeplitz conv weight with BN scale folded in
    p_ref: (2, Np)    rows = [bn_shift, prelu_alpha], tiled over wo
    o_ref: (tm, Np)   lane-dense output tile
    """
    acc = jnp.dot(x_ref[...], w_ref[...], preferred_element_type=jnp.float32)
    y = acc + p_ref[0:1, :]
    y = jnp.where(y > 0, y, p_ref[1:2, :] * y)
    o_ref[...] = y.astype(o_ref.dtype)


def prepare_conv_bn_prelu(params, *, stride, pad, height, width, eps=1e-5,
                          compute_dtype=jnp.float32):
    """Hoisted weight-side preprocessing: run once when weights / BN stats change."""
    w_oihw, b, gamma, beta, rmean, rvar, alpha = params
    cout, cin, kh, kw = w_oihw.shape
    hp, wp = height + 2 * pad, width + 2 * pad
    ho = (height + 2 * pad - kh) // stride + 1
    wo = (width + 2 * pad - kw) // stride + 1

    # Fold conv bias + BN(eval) into per-channel scale/shift; scale goes into W.
    scale = gamma / jnp.sqrt(rvar + eps)                        # (cout,)
    shift = (b - rmean) * scale + beta                          # (cout,)
    if alpha.size == 1:
        alpha_c = jnp.broadcast_to(alpha.reshape(()), (cout,))
    elif alpha.size == cout:
        alpha_c = alpha.reshape(cout)
    else:
        raise ValueError("PReLU num_parameters must be 1 or conv_out")

    # Block-Toeplitz over W (BN scale folded), stacked over kernel rows:
    #   w_mat[(i*wp + wcol)*cin + ci, ow*cout + co]
    #     = w[co, ci, i, wcol - ow*stride] * scale[co]  if 0 <= wcol - ow*stride < kw
    w_hwio = jnp.transpose(w_oihw, (2, 3, 1, 0)) * scale[None, None, None, :]
    j_off = jnp.arange(wp)[:, None] - jnp.arange(wo)[None, :] * stride
    valid = (j_off >= 0) & (j_off < kw)
    w_g = w_hwio[:, jnp.clip(j_off, 0, kw - 1), :, :]           # (kh, wp, wo, cin, cout)
    w_g = jnp.where(valid[None, :, :, None, None], w_g, 0.0)
    w_mat = jnp.transpose(w_g, (0, 1, 3, 2, 4)).reshape(kh * wp * cin, wo * cout)

    # Lane/sublane density guards (generic: K -> mult of 8, N -> mult of 128).
    K, N = kh * wp * cin, wo * cout
    Kp, Np = _round_up(K, 8), _round_up(N, 128)
    w_mat = jnp.pad(w_mat, ((0, Kp - K), (0, Np - N))).astype(compute_dtype)
    p = jnp.stack([jnp.tile(shift, wo), jnp.tile(alpha_c, wo)], axis=0)
    p = jnp.pad(p, ((0, 0), (0, Np - N))).astype(jnp.float32)   # (2, Np)

    meta = dict(stride=stride, pad=pad, kh=kh, cin=cin, cout=cout, ho=ho, wo=wo,
                hp=hp, wp=wp, K=K, Kp=Kp, N=N, Np=Np, compute_dtype=compute_dtype)
    return w_mat, p, meta


def make_conv_bn_prelu_dropout(w_mat, p, meta, *, tm_max=256):
    """Returns a jitted NCHW -> NCHW forward closing over the prepared params."""
    stride, pad = meta["stride"], meta["pad"]
    kh, cin, cout = meta["kh"], meta["cin"], meta["cout"]
    ho, wo, hp, wp = meta["ho"], meta["wo"], meta["hp"], meta["wp"]
    K, Kp, N, Np = meta["K"], meta["Kp"], meta["N"], meta["Np"]
    compute_dtype = meta["compute_dtype"]
    # Static H-im2col row indices: rows oh*stride + i, i in [0, kh).
    row_idx = np.arange(ho)[:, None] * stride + np.arange(kh)[None, :]   # (ho, kh)

    @jax.jit
    def forward(x_nchw):
        n, _, h, w_in = x_nchw.shape
        assert h + 2 * pad == hp and w_in + 2 * pad == wp
        out_dtype = x_nchw.dtype

        # Layout glue, fused by XLA under this jit: NCHW -> padded NHWC rows,
        # then im2col over H only (W is handled by the block-Toeplitz weight).
        x_nhwc = jnp.transpose(x_nchw, (0, 2, 3, 1))
        x_pad = jnp.pad(x_nhwc, ((0, 0), (pad, pad), (pad, pad), (0, 0)))
        x_rows = x_pad.reshape(n, hp, wp * cin)
        lhs = x_rows[:, row_idx].reshape(n * ho, K)              # (M, K)

        # Batch merged into M; pad so blocks stay (8, 128)-aligned.
        M = n * ho
        m8 = _round_up(M, 8)
        tm = min(tm_max, m8)
        Mp = _round_up(m8, tm)
        lhs = jnp.pad(lhs, ((0, Mp - M), (0, Kp - K))).astype(compute_dtype)

        el = jnp.dtype(compute_dtype).itemsize
        cost = pl.CostEstimate(
            flops=2 * Mp * Kp * Np, transcendentals=0,
            bytes_accessed=(Mp * Kp + Kp * Np) * el + 2 * Np * 4
                           + Mp * Np * jnp.dtype(out_dtype).itemsize)

        out = pl.pallas_call(
            _matmul_bn_prelu_kernel,
            out_shape=jax.ShapeDtypeStruct((Mp, Np), out_dtype),
            grid_spec=pltpu.PrefetchScalarGridSpec(
                num_scalar_prefetch=0,
                grid=(Mp // tm,),                    # n=2 -> a single grid step
                in_specs=[
                    pl.BlockSpec((tm, Kp), lambda m: (m, 0)),
                    pl.BlockSpec((Kp, Np), lambda m: (0, 0)),
                    pl.BlockSpec((2, Np), lambda m: (0, 0)),
                ],
                out_specs=pl.BlockSpec((tm, Np), lambda m: (m, 0)),
            ),
            compiler_params=pltpu.CompilerParams(
                dimension_semantics=("parallel",)),
            cost_estimate=cost,
        )(lhs, w_mat, p)

        out = out[:M, :N].reshape(n, ho, wo, cout)
        return jnp.transpose(out, (0, 3, 1, 2))                  # back to NCHW

    return forward


def reference_forward(x_nchw, params, *, stride, pad, eps=1e-5):
    """Pure-JAX reference of the eval-mode PyTorch forward."""
    w_oihw, b, gamma, beta, rmean, rvar, alpha = params
    y = jax.lax.conv_general_dilated(
        x_nchw, w_oihw, window_strides=(stride, stride),
        padding=[(pad, pad), (pad, pad)],
        dimension_numbers=("NCHW", "OIHW", "NCHW"))
    y = y + b[None, :, None, None]
    inv = 1.0 / jnp.sqrt(rvar + eps)
    y = (y - rmean[None, :, None, None]) * (gamma * inv)[None, :, None, None] \
        + beta[None, :, None, None]
    a = jnp.broadcast_to(alpha.reshape(-1), (y.shape[1],))[None, :, None, None]
    y = jnp.where(y > 0, y, a * y)
    return y  # Dropout2d(eval) == identity


if __name__ == "__main__":
    # TODO(synk): training-mode Dropout2d and BN batch-stat updates are not
    # implemented; this is the eval/inference forward only.
    conv_in, conv_out, conv_ker, conv_stri, pad = 4, 8, 3, 1, 1
    bn_C, prelu_a, drop_rate = conv_out, conv_out, 0.5   # drop_rate unused in eval
    H = W = 16

    key = jax.random.PRNGKey(0)
    kx, kw, kb, kg, kbe, krm, krv, ka = jax.random.split(key, 8)

    x = jax.random.normal(kx, (2, conv_in, H, W), dtype=jnp.float32)
    w = 0.1 * jax.random.normal(kw, (conv_out, conv_in, conv_ker, conv_ker), jnp.float32)
    b = 0.1 * jax.random.normal(kb, (conv_out,), jnp.float32)
    gamma = 1.0 + 0.1 * jax.random.normal(kg, (bn_C,), jnp.float32)
    beta = 0.1 * jax.random.normal(kbe, (bn_C,), jnp.float32)
    running_mean = 0.1 * jax.random.normal(krm, (bn_C,), jnp.float32)
    running_var = 0.5 + jnp.abs(jax.random.normal(krv, (bn_C,), jnp.float32)) * 0.5
    alpha = 0.25 + 0.05 * jax.random.normal(ka, (prelu_a,), jnp.float32)
    params = (w, b, gamma, beta, running_mean, running_var, alpha)

    y_ref = reference_forward(x, params, stride=conv_stri, pad=pad)

    # f32 operand path (default): tight tolerance.
    w_mat, p, meta = prepare_conv_bn_prelu(
        params, stride=conv_stri, pad=pad, height=H, width=W,
        compute_dtype=jnp.float32)
    fwd_f32 = make_conv_bn_prelu_dropout(w_mat, p, meta)
    y_f32 = jax.block_until_ready(fwd_f32(x))
    assert y_f32.shape == y_ref.shape == (2, conv_out, H, W)
    assert jnp.allclose(y_f32, y_ref, atol=1e-4, rtol=1e-4), \
        float(jnp.max(jnp.abs(y_f32 - y_ref)))

    # bf16 operand path (v6e/v7x native MXU; f32 accumulate + f32 epilogue).
    w_mat16, p16, meta16 = prepare_conv_bn_prelu(
        params, stride=conv_stri, pad=pad, height=H, width=W,
        compute_dtype=jnp.bfloat16)
    fwd_bf16 = make_conv_bn_prelu_dropout(w_mat16, p16, meta16)
    y_bf16 = jax.block_until_ready(fwd_bf16(x))
    assert jnp.allclose(y_bf16, y_ref, atol=1e-1, rtol=1e-1), \
        float(jnp.max(jnp.abs(y_bf16 - y_ref)))

    print("KERNEL_OK")
</pallas_src>

<mosaic_0001>
module attributes {stable_mosaic.version = 11 : i64} {
  func.func @_matmul_bn_prelu_kernel(%arg0: i32, %arg1: memref<32x216xf32, #tpu.memory_space<vmem>>, %arg2: memref<216x128xf32, #tpu.memory_space<vmem>>, %arg3: memref<2x128xf32, #tpu.memory_space<vmem>>, %arg4: memref<32x128xf32, #tpu.memory_space<vmem>>) attributes {dimension_semantics = [#tpu.dimension_semantics<parallel>], iteration_bounds = array<i64: 1>, scalar_prefetch = 0 : i64, scratch_operands = 0 : i64, tpu.core_type = #tpu.core_type<tc>, window_params = [{transform_indices = @transform_0, window_bounds = array<i64: 32, 216>}, {pipeline_mode = #tpu.pipeline_mode<synchronous>, transform_indices = @transform_1, window_bounds = array<i64: 216, 128>}, {pipeline_mode = #tpu.pipeline_mode<synchronous>, transform_indices = @transform_2, window_bounds = array<i64: 2, 128>}, {transform_indices = @transform_3, window_bounds = array<i64: 32, 128>}]} {
    %c0 = arith.constant 0 : index
    %c0_0 = arith.constant 0 : index
    %0 = vector.load %arg1[%c0, %c0_0] : memref<32x216xf32, #tpu.memory_space<vmem>>, vector<32x216xf32>
    %c0_1 = arith.constant 0 : index
    %c0_2 = arith.constant 0 : index
    %1 = vector.load %arg2[%c0_1, %c0_2] : memref<216x128xf32, #tpu.memory_space<vmem>>, vector<216x128xf32>
    %cst = arith.constant dense<0.000000e+00> : vector<32x128xf32>
    %2 = tpu.matmul %0, %1, %cst {dimension_numbers = #tpu.dot_dimension_numbers<[1], [0], [0], [1], [0, 0, 1, 1], [], []>} : vector<32x216xf32>, vector<216x128xf32>, vector<32x128xf32> -> vector<32x128xf32>
    %c0_3 = arith.constant 0 : index
    %c0_4 = arith.constant 0 : index
    %3 = vector.load %arg3[%c0_3, %c0_4] : memref<2x128xf32, #tpu.memory_space<vmem>>, vector<1x128xf32>
    %4 = vector.broadcast %3 : vector<1x128xf32> to vector<32x128xf32>
    %5 = arith.addf %2, %4 : vector<32x128xf32>
    %cst_5 = arith.constant 0.000000e+00 : f32
    %6 = vector.broadcast %cst_5 : f32 to vector<32x128xf32>
    %7 = arith.cmpf ogt, %5, %6 : vector<32x128xf32>
    %c1 = arith.constant 1 : index
    %c0_6 = arith.constant 0 : index
    %8 = vector.load %arg3[%c1, %c0_6] : memref<2x128xf32, #tpu.memory_space<vmem>>, vector<1x128xf32>
    %9 = vector.broadcast %8 : vector<1x128xf32> to vector<32x128xf32>
    %10 = arith.mulf %9, %5 : vector<32x128xf32>
    %11 = arith.select %7, %5, %10 : vector<32x128xi1>, vector<32x128xf32>
    %c0_7 = arith.constant 0 : index
    %c0_8 = arith.constant 0 : index
    %12 = vector.load %arg4[%c0_7, %c0_8] : memref<32x128xf32, #tpu.memory_space<vmem>>, vector<32x128xf32>
    tpu.vector_store %arg4[%c0_7, %c0_8], %11 {strides = array<i32>} : memref<32x128xf32, #tpu.memory_space<vmem>>, vector<32x128xf32>,
    return
  }
  func.func @transform_0(%arg0: i32) -> (i32, i32) {
    %c0_i32 = arith.constant 0 : i32
    %c0_i32_0 = arith.constant 0 : i32
    return %arg0, %c0_i32 : i32, i32
  }
  func.func @transform_1(%arg0: i32) -> (i32, i32) {
    %c0_i32 = arith.constant 0 : i32
    %c0_i32_0 = arith.constant 0 : i32
    %c0_i32_1 = arith.constant 0 : i32
    return %c0_i32, %c0_i32_0 : i32, i32
  }
  func.func @transform_2(%arg0: i32) -> (i32, i32) {
    %c0_i32 = arith.constant 0 : i32
    %c0_i32_0 = arith.constant 0 : i32
    %c0_i32_1 = arith.constant 0 : i32
    return %c0_i32, %c0_i32_0 : i32, i32
  }
  func.func @transform_3(%arg0: i32) -> (i32, i32) {
    %c0_i32 = arith.constant 0 : i32
    %c0_i32_0 = arith.constant 0 : i32
    return %arg0, %c0_i32 : i32, i32
  }
}

</mosaic_0001>

<bundles_post_ra>
// kernel: forward.1
= control target key start
LH: loop header
LB: loop body
LE: loop exit
PB: predicated region body
PF: predicated region fallthrough
CT: control target
= control target key end

     0   :  { %vm51_vm0 = vcmask 719872   ;;  %s329_s1 = inlined_call_operand.vmem [shape: f32[216,128], index: 1, kind: input, shape index: {}]   ;;  %s330_s0 = inlined_call_operand.vmem [shape: f32[32,216], index: 0, kind: input, shape index: {}]   ;;  %s331_s2 = inlined_call_operand.vmem [shape: f32[2,128], index: 2, kind: input, shape index: {}]   ;;  %s332_s3 = inlined_call_operand.vmem [shape: f32[32,128], index: 3, kind: output, shape index: {}]  }
   0x1   :  { %v37_v0 = vld [vmem:[%s329_s1 + $0x78] sm:$0xff]  ;;  %v36_v1 = vld [vmem:[%s329_s1 + $0x70] sm:$0xff]  ;;  %v47_v3 = vld [vmem:[%s329_s1 + $0xc8] sm:$0xff] }
   0x2   :  { %v48_v2 = vld [vmem:[%s329_s1 + $0xd0] sm:$0xff]  ;;  %64 = vmatpush.msra.mxu0 %v37_v0  ;;  %148 = vmatpush.msra.mxu2 %v37_v0  ;;  %v35_v4 = vld [vmem:[%s329_s1 + $0x68] sm:$0xff]  ;;  %v46_v5 = vld [vmem:[%s329_s1 + $0xc0] sm:$0xff] }
   0x3   :  { %149 = vmatpush.msra.mxu3 %v37_v0  ;;  %98 = vmatpush.msra.mxu1 %v48_v2  ;;  %v34_v6 = vld [vmem:[%s329_s1 + $0x60] sm:$0xff]  ;;  %v45_v7 = vld [vmem:[%s329_s1 + $0xb8] sm:$0xff]  ;;  %v44_v9 = vld [vmem:[%s329_s1 + $0xb0] sm:$0xff] }
   0x4   :  { %65 = vmatpush.msra.mxu0 %v36_v1  ;;  %150 = vmatpush.msra.mxu2 %v36_v1  ;;  %v33_v8 = vld [vmem:[%s329_s1 + $0x58] sm:$0xff]  ;;  %v32_v10 = vld [vmem:[%s329_s1 + $0x50] sm:$0xff]  ;;  %v43_v11 = vld [vmem:[%s329_s1 + $0xa8] sm:$0xff] }
   0x5   :  { %151 = vmatpush.msra.mxu3 %v36_v1  ;;  %99 = vmatpush.msra.mxu1 %v47_v3  ;;  %v31_v12 = vld [vmem:[%s329_s1 + $0x48] sm:$0xff]  ;;  %v42_v13 = vld [vmem:[%s329_s1 + $0xa0] sm:$0xff]  ;;  %v41_v15 = vld [vmem:[%s329_s1 + $0x98] sm:$0xff] }
   0x6   :  { %66 = vmatpush.msra.mxu0 %v35_v4  ;;  %152 = vmatpush.msra.mxu2 %v35_v4  ;;  %v30_v14 = vld [vmem:[%s329_s1 + $0x40] sm:$0xff]  ;;  %v29_v16 = vld [vmem:[%s329_s1 + $0x38] sm:$0xff]  ;;  %v40_v17 = vld [vmem:[%s329_s1 + $0x90] sm:$0xff] }
   0x7   :  { %153 = vmatpush.msra.mxu3 %v35_v4  ;;  %100 = vmatpush.msra.mxu1 %v46_v5  ;;  %v28_v18 = vld [vmem:[%s329_s1 + $0x30] sm:$0xff]  ;;  %v39_v19 = vld [vmem:[%s329_s1 + $0x88] sm:$0xff]  ;;  %v38_v21 = vld [vmem:[%s329_s1 + $0x80] sm:$0xff] }
   0x8   :  { %67 = vmatpush.msra.mxu0 %v34_v6  ;;  %154 = vmatpush.msra.mxu2 %v34_v6  ;;  %v27_v20 = vld [vmem:[%s329_s1 + $0x28] sm:$0xff]  ;;  %v26_v22 = vld [vmem:[%s329_s1 + $0x20] sm:$0xff]  ;;  %v25_v24 = vld [vmem:[%s329_s1 + $0x18] sm:$0xff] }
   0x9   :  { %155 = vmatpush.msra.mxu3 %v34_v6  ;;  %101 = vmatpush.msra.mxu1 %v45_v7  ;;  %v15_v23 = vld [vmem:[%s330_s0 + $0x8] sm:$0xff]  ;;  %v24_v25 = vld [vmem:[%s329_s1 + $0x10] sm:$0xff]  ;;  %v22_v27 = vld [vmem:[%s329_s1] sm:$0xff] }
   0xa   :  { %68 = vmatpush.msra.mxu0 %v33_v8  ;;  %156 = vmatpush.msra.mxu2 %v33_v8  ;;  %v23_v26 = vld [vmem:[%s329_s1 + $0x8] sm:$0xff]  ;;  %v14_v28 = vld [vmem:[%s330_s0] sm:$0xff]  ;;  %v16_v29 = vld [vmem:[%s330_s0 + $0x10] sm:$0xff] }
   0xb   :  { %157 = vmatpush.msra.mxu3 %v33_v8  ;;  %102 = vmatpush.msra.mxu1 %v44_v9  ;;  %v18_v30 = vld [vmem:[%s330_s0 + $0x20] sm:$0xff]  ;;  %v17_v31 = vld [vmem:[%s330_s0 + $0x18] sm:$0xff]  ;;  %v20_v32 = vld [vmem:[%s330_s0 + $0x30] sm:$0xff] }
   0xc   :  { %69 = vmatpush.msra.mxu0 %v32_v10  ;;  %158 = vmatpush.msra.mxu2 %v32_v10  ;;  %v19_v33 = vld [vmem:[%s330_s0 + $0x28] sm:$0xff]  ;;  %v21_v34 = vld [vmem:[%s330_s0 + $0x38] sm:$0xff]  ;;  %v180_v36 = vld [vmem:[%s331_s2] ss:$0 sm:$0xff] }
   0xd   :  { %159 = vmatpush.msra.mxu3 %v32_v10  ;;  %103 = vmatpush.msra.mxu1 %v43_v11  ;;  %v181_v39 = vld [vmem:[%s331_s2 + $0x1] ss:$0 sm:$0xff] }
   0xe   :  { %70 = vmatpush.msra.mxu0 %v31_v12  ;;  %160 = vmatpush.msra.mxu2 %v31_v12 }
   0xf   :  { %161 = vmatpush.msra.mxu3 %v31_v12  ;;  %104 = vmatpush.msra.mxu1 %v42_v13 }
  0x10   :  { %71 = vmatpush.msra.mxu0 %v30_v14  ;;  %162 = vmatpush.msra.mxu2 %v30_v14 }
  0x11   :  { %163 = vmatpush.msra.mxu3 %v30_v14  ;;  %105 = vmatpush.msra.mxu1 %v41_v15 }
  0x12   :  { %72 = vmatpush.msra.mxu0 %v29_v16  ;;  %164 = vmatpush.msra.mxu2 %v29_v16 }
  0x13   :  { %165 = vmatpush.msra.mxu3 %v29_v16  ;;  %106 = vmatpush.msra.mxu1 %v40_v17 }
  0x14   :  { %73 = vmatpush.msra.mxu0 %v28_v18  ;;  %166 = vmatpush.msra.mxu2 %v28_v18 }
  0x15   :  { %167 = vmatpush.msra.mxu3 %v28_v18  ;;  %107 = vmatpush.msra.mxu1 %v39_v19 }
  0x16   :  { %74 = vmatpush.msra.mxu0 %v27_v20  ;;  %168 = vmatpush.msra.mxu2 %v27_v20 }
  0x17   :  { %169 = vmatpush.msra.mxu3 %v27_v20  ;;  %108 = vmatpush.msra.mxu1 %v38_v21 }
  0x18   :  { %75 = vmatpush.msra.mxu0 %v26_v22  ;;  %170 = vmatpush.msra.mxu2 %v26_v22 }
  0x19   :  { %171 = vmatpush.msra.mxu3 %v26_v22  ;;  %144 = vmatmul.msk.f32.vlgmr.msra.gmra.mxu1 %vm51_vm0, %v15_v23 }
  0x1a   :  { %76 = vmatpush.msra.mxu0 %v25_v24  ;;  %172 = vmatpush.msra.mxu2 %v25_v24 }
  0x1b   :  { %173 = vmatpush.msra.mxu3 %v25_v24 }
  0x1c   :  { %77 = vmatpush.msra.mxu0 %v24_v25  ;;  %174 = vmatpush.msra.mxu2 %v24_v25 }
  0x1d   :  { %175 = vmatpush.msra.mxu3 %v24_v25 }
  0x1e   :  { %78 = vmatpush.msra.mxu0 %v23_v26  ;;  %176 = vmatpush.msra.mxu2 %v23_v26 }
  0x1f   :  { %177 = vmatpush.msra.mxu3 %v23_v26 }
  0x20   :  { %79 = vmatpush.msra.mxu0 %v22_v27  ;;  %178 = vmatpush.msra.mxu2 %v22_v27 }
  0x21   :  { %179 = vmatpush.msra.mxu3 %v22_v27  ;;  %80 = vmatmul.f32.vlgmr.msra.gmra.mxu0 %v14_v28 }
  0x22   :  { %83 = vmatmul.f32.vlgmr.msra.gmra.mxu2 %v16_v29  ;;  %86 = vmatmul.f32.vlgmr.msra.gmra.mxu3 %v18_v30 }
  0x23   :  { %145 = vmatmul.msk.f32.gmra.mxu1 %vm51_vm0, %v17_v31 }
  0x2a   :  { %89 = vmatmul.f32.gmra.mxu3 %v20_v32 }
  0x2b   :  { %146 = vmatmul.msk.f32.gmra.mxu1 %vm51_vm0, %v19_v33 }
  0x33   :  { %147 = vmatmul.msk.f32.gmra.mxu1 %vm51_vm0, %v21_v34 }
  0x96   :  { %v110_v35 = vpop.f32.mrf.mxu1 }
  0x9e   :  { %v81_v37 = vpop.f32.mrf.mxu0 }
  0x9f   :  { %v82_v38 = vadd.f32 %v180_v36, %v81_v37 }
  0xa0   :  { %v113_v40 = vpop.f32.mrf.mxu1 }
  0xa1   :  { %v111_v41 = vadd.f32 %v110_v35, %v82_v38 }
  0xa3   :  { %vm122_vm1 = vcmp.gt.f32.partialorder %v111_v41, 0.0  ;;  %v128_v42 = vmul.f32 %v181_v39, %v111_v41 }
  0xa5   :  { %v132_v43 = vsel %vm122_vm1, %v111_v41, %v128_v42  ;;  %v84_v44 = vpop.f32.mrf.mxu2  ;;  %v87_v45 = vpop.f32.mrf.mxu3 }
  0xa6   :  { %136 = vst [vmem:[%s332_s3] sm:$0xff] %v132_v43  ;;  %v85_v46 = vadd.f32 %v180_v36, %v84_v44  ;;  %v88_v47 = vadd.f32 %v180_v36, %v87_v45 }
  0xa8   :  { %v114_v48 = vadd.f32 %v113_v40, %v85_v46  ;;  %v116_v49 = vpop.f32.mrf.mxu1 }
  0xa9   :  { %v117_v50 = vadd.f32 %v116_v49, %v88_v47 }
  0xaa   :  { %vm123_vm2 = vcmp.gt.f32.partialorder %v114_v48, 0.0  ;;  %v129_v51 = vmul.f32 %v181_v39, %v114_v48 }
  0xab   :  { %vm124_vm3 = vcmp.gt.f32.partialorder %v117_v50, 0.0  ;;  %v130_v52 = vmul.f32 %v181_v39, %v117_v50 }
  0xac   :  { %v133_v53 = vsel %vm123_vm2, %v114_v48, %v129_v51 }
  0xad   :  { %137 = vst [vmem:[%s332_s3 + $0x8] sm:$0xff] %v133_v53  ;;  %v134_v54 = vsel %vm124_vm3, %v117_v50, %v130_v52  ;;  %v90_v55 = vpop.f32.mrf.mxu3 }
  0xae   :  { %138 = vst [vmem:[%s332_s3 + $0x10] sm:$0xff] %v134_v54  ;;  %v91_v56 = vadd.f32 %v180_v36, %v90_v55 }
  0xb0   :  { %v119_v57 = vpop.f32.mrf.mxu1 }
  0xb1   :  { %v120_v58 = vadd.f32 %v119_v57, %v91_v56 }
  0xb3   :  { %vm125_vm4 = vcmp.gt.f32.partialorder %v120_v58, 0.0  ;;  %v131_v59 = vmul.f32 %v181_v39, %v120_v58 }
  0xb5   :  { %v135_v60 = vsel %vm125_vm4, %v120_v58, %v131_v59 }
  0xb6   :  { %139 = vst [vmem:[%s332_s3 + $0x18] sm:$0xff] %v135_v60 }

</bundles_post_ra>
